<compile_context>
chip_gen: v7x
topology: tpu7x:2x2x1
jax: 0.10.0
libtpu: 0.0.40
codegen_flags: <defaults>
</compile_context>

<pallas_src>
import functools

import jax
import jax.numpy as jnp
from jax.experimental import pallas as pl
from jax.experimental.pallas import tpu as pltpu

MAX_SEQUENCE_LENGTH = 128
_LANES = 128


def _encoder_kernel(seq_ref, w_ref, pos_ref, out_ref):
    # seq_ref: (tm//P, P*A)   packed input rows for this tile (streamed)
    # w_ref:   (P*A, P*D)     block-diagonal replicated W^T (resident)
    # pos_ref: (L//P, P*D)    position embedding with bias folded in (resident)
    # out_ref: (tm//P, P*D)   lane-dense output tile (P*D == 128 when packed)
    x = seq_ref[...]
    y = jnp.dot(x, w_ref[...], preferred_element_type=jnp.float32)
    pos = pos_ref[...].astype(jnp.float32)
    n_chunks = y.shape[0] // pos.shape[0]          # static (trace-time) value
    if n_chunks == 1:
        y = y + pos
    else:
        # Broadcast pos over the full sequences contained in this row tile.
        # Sublane-only split/merge; minor (lane) dim is unchanged -> no relayout.
        y = (y.reshape(n_chunks, pos.shape[0], pos.shape[1]) + pos[None]).reshape(y.shape)
    out_ref[...] = y.astype(out_ref.dtype)


def _pick_row_tile(rows, L, max_rows):
    """Largest multiple of L dividing rows, <= max_rows; prefer an even grid."""
    limit = min(rows, max_rows)
    candidates = [m for m in range(L, limit + 1, L) if rows % m == 0]
    if not candidates:
        return rows
    # Prefer the largest tile whose grid is even (balances v7x's 2 TensorCores),
    # then any tile with >= 2 grid steps, then a single full-size block.
    even = [m for m in candidates if (rows // m) % 2 == 0]
    if even:
        return max(even)
    multi = [m for m in candidates if rows // m >= 2]
    return max(multi) if multi else max(candidates)


@functools.partial(jax.jit, static_argnames=("max_rows_per_block", "out_dtype"))
def sequence_encoder(seq, weight, bias, pos_emb, *,
                     max_rows_per_block=16384, out_dtype=None):
    """Forward pass of SequenceEncoder.

    seq:     (B, L, A) with L == MAX_SEQUENCE_LENGTH
    weight:  (D, A)   -- nn.Linear weight
    bias:    (D,)     -- nn.Linear bias
    pos_emb: (1, L, D)
    returns: (B, L, D) == seq @ weight.T + bias + pos_emb
    """
    B, L, A = seq.shape
    D = weight.shape[0]
    assert L == MAX_SEQUENCE_LENGTH
    assert weight.shape == (D, A)
    rows = B * L
    out_dt = jnp.dtype(seq.dtype) if out_dtype is None else jnp.dtype(out_dtype)

    # Packing factor: P positions per kernel row so the output minor dim is a
    # full 128 lanes (unmasked, lane-dense stores).  Falls back to P=1 for odd D.
    if D < _LANES and _LANES % D == 0 and (_LANES // D) <= 16 and L % (_LANES // D) == 0:
        P = _LANES // D
    else:
        P = 1

    tm = _pick_row_tile(rows, L, max_rows_per_block)   # rows (positions) per grid step
    grid = rows // tm

    # Packed / reshaped operands (pure metadata or tiny one-time XLA work).
    # NOTE: w_block / pos_pack could be precomputed once by the caller and
    # closed over to remove even this tiny per-call work.
    seq_pack = seq.reshape(rows // P, P * A)
    w_t = weight.T                                      # (A, D)
    if P == 1:
        w_block = w_t
    else:
        eye = jnp.eye(P, dtype=w_t.dtype)
        w_block = jnp.einsum("gh,ad->gahd", eye, w_t).reshape(P * A, P * D)
    pos_fold = (pos_emb.reshape(L, D) + bias[None, :]).astype(jnp.float32)
    pos_pack = pos_fold.reshape(L // P, P * D)

    # Explicit scoped-VMEM budget: double-buffered streamed tiles + resident
    # operands + headroom.  Keeps large tiles compiling on v5e (16 MiB default)
    # and stays well under v7x's 64 MiB physical VMEM.
    in_item = jnp.dtype(seq.dtype).itemsize
    par_item = jnp.dtype(weight.dtype).itemsize
    in_tile_bytes = (tm // P) * (P * A) * in_item
    out_tile_bytes = (tm // P) * (P * D) * out_dt.itemsize
    w_bytes = (P * A) * (P * D) * par_item
    pos_bytes = (L // P) * (P * D) * 4
    vmem_limit = 2 * (in_tile_bytes + out_tile_bytes + w_bytes + pos_bytes) + (2 << 20)
    vmem_limit = min(max(vmem_limit, 4 << 20), 48 << 20)

    cost = pl.CostEstimate(
        flops=2 * (rows // P) * (P * A) * (P * D),
        transcendentals=0,
        bytes_accessed=rows * A * in_item + rows * D * out_dt.itemsize
                       + w_bytes + pos_bytes,
    )

    out_flat = pl.pallas_call(
        _encoder_kernel,
        out_shape=jax.ShapeDtypeStruct((rows // P, P * D), out_dt),
        grid_spec=pltpu.PrefetchScalarGridSpec(
            num_scalar_prefetch=0,
            grid=(grid,),
            in_specs=[
                pl.BlockSpec((tm // P, P * A), lambda i: (i, 0)),   # streamed rows
                pl.BlockSpec((P * A, P * D), lambda i: (0, 0)),     # weight (resident)
                pl.BlockSpec((L // P, P * D), lambda i: (0, 0)),    # pos+bias (resident)
            ],
            out_specs=pl.BlockSpec((tm // P, P * D), lambda i: (i, 0)),
        ),
        compiler_params=pltpu.CompilerParams(
            dimension_semantics=("parallel",),
            vmem_limit_bytes=int(vmem_limit),
        ),
        cost_estimate=cost,
    )(seq_pack, w_block, pos_pack)

    return out_flat.reshape(B, L, D)


if __name__ == "__main__":
    # Small shapes consistent with the module's forward:
    #   seq: (B, MAX_SEQUENCE_LENGTH, num_amino_acids), dim = D
    B, L, A, D = 2, MAX_SEQUENCE_LENGTH, 20, 32

    key = jax.random.PRNGKey(0)
    k_seq, k_w, k_b, k_pos = jax.random.split(key, 4)

    seq = jax.random.normal(k_seq, (B, L, A), dtype=jnp.float32)

    # Deterministic parameter init (nn.Linear: weight (D, A), bias (D);
    # position_embedding: randn(1, L, D)).
    bound = 1.0 / (A ** 0.5)
    weight = jax.random.uniform(k_w, (D, A), dtype=jnp.float32, minval=-bound, maxval=bound)
    bias = jax.random.uniform(k_b, (D,), dtype=jnp.float32, minval=-bound, maxval=bound)
    pos_emb = jax.random.normal(k_pos, (1, L, D), dtype=jnp.float32)

    out = sequence_encoder(seq, weight, bias, pos_emb)
    out = jax.block_until_ready(out)

    # Pure-JAX reference check.
    ref = jnp.einsum("bla,da->bld", seq, weight) + bias[None, None, :] + pos_emb
    assert out.shape == (B, L, D)
    assert jnp.allclose(out, ref, atol=1e-5, rtol=1e-5)

    print("KERNEL_OK")
</pallas_src>

<mosaic_0001>
module attributes {stable_mosaic.version = 11 : i64} {
  func.func @_encoder_kernel(%arg0: i32, %arg1: memref<32x80xf32, #tpu.memory_space<vmem>>, %arg2: memref<80x128xf32, #tpu.memory_space<vmem>>, %arg3: memref<32x128xf32, #tpu.memory_space<vmem>>, %arg4: memref<32x128xf32, #tpu.memory_space<vmem>>) attributes {dimension_semantics = [#tpu.dimension_semantics<parallel>], iteration_bounds = array<i64: 2>, scalar_prefetch = 0 : i64, scratch_operands = 0 : i64, tpu.core_type = #tpu.core_type<tc>, window_params = [{transform_indices = @transform_0, window_bounds = array<i64: 32, 80>}, {pipeline_mode = #tpu.pipeline_mode<synchronous>, transform_indices = @transform_1, window_bounds = array<i64: 80, 128>}, {pipeline_mode = #tpu.pipeline_mode<synchronous>, transform_indices = @transform_2, window_bounds = array<i64: 32, 128>}, {transform_indices = @transform_3, window_bounds = array<i64: 32, 128>}]} {
    %c0 = arith.constant 0 : index
    %c0_0 = arith.constant 0 : index
    %0 = vector.load %arg1[%c0, %c0_0] : memref<32x80xf32, #tpu.memory_space<vmem>>, vector<32x80xf32>
    %c0_1 = arith.constant 0 : index
    %c0_2 = arith.constant 0 : index
    %1 = vector.load %arg2[%c0_1, %c0_2] : memref<80x128xf32, #tpu.memory_space<vmem>>, vector<80x128xf32>
    %cst = arith.constant dense<0.000000e+00> : vector<32x128xf32>
    %2 = tpu.matmul %0, %1, %cst {dimension_numbers = #tpu.dot_dimension_numbers<[1], [0], [0], [1], [0, 0, 1, 1], [], []>} : vector<32x80xf32>, vector<80x128xf32>, vector<32x128xf32> -> vector<32x128xf32>
    %c0_3 = arith.constant 0 : index
    %c0_4 = arith.constant 0 : index
    %3 = vector.load %arg3[%c0_3, %c0_4] : memref<32x128xf32, #tpu.memory_space<vmem>>, vector<32x128xf32>
    %4 = arith.addf %2, %3 : vector<32x128xf32>
    %c0_5 = arith.constant 0 : index
    %c0_6 = arith.constant 0 : index
    %5 = vector.load %arg4[%c0_5, %c0_6] : memref<32x128xf32, #tpu.memory_space<vmem>>, vector<32x128xf32>
    tpu.vector_store %arg4[%c0_5, %c0_6], %4 {strides = array<i32>} : memref<32x128xf32, #tpu.memory_space<vmem>>, vector<32x128xf32>,
    return
  }
  func.func @transform_0(%arg0: i32) -> (i32, i32) {
    %c0_i32 = arith.constant 0 : i32
    %c0_i32_0 = arith.constant 0 : i32
    return %arg0, %c0_i32 : i32, i32
  }
  func.func @transform_1(%arg0: i32) -> (i32, i32) {
    %c0_i32 = arith.constant 0 : i32
    %c0_i32_0 = arith.constant 0 : i32
    %c0_i32_1 = arith.constant 0 : i32
    return %c0_i32, %c0_i32_0 : i32, i32
  }
  func.func @transform_2(%arg0: i32) -> (i32, i32) {
    %c0_i32 = arith.constant 0 : i32
    %c0_i32_0 = arith.constant 0 : i32
    %c0_i32_1 = arith.constant 0 : i32
    return %c0_i32, %c0_i32_0 : i32, i32
  }
  func.func @transform_3(%arg0: i32) -> (i32, i32) {
    %c0_i32 = arith.constant 0 : i32
    %c0_i32_0 = arith.constant 0 : i32
    return %arg0, %c0_i32 : i32, i32
  }
}

</mosaic_0001>

<bundles_post_ra>
// kernel: sequence_encoder.1
= control target key start
LH: loop header
LB: loop body
LE: loop exit
PB: predicated region body
PF: predicated region fallthrough
CT: control target
= control target key end

     0   :  { %s471_s12 = smov 0   ;;  %s541_s0 = inlined_call_operand.vmem [shape: f32[64,80], index: 0, kind: input, shape index: {}]   ;;  %s542_s1 = inlined_call_operand.vmem [shape: f32[80,128], index: 1, kind: input, shape index: {}]   ;;  %s543_s2 = inlined_call_operand.vmem [shape: f32[32,128], index: 2, kind: input, shape index: {}]   ;;  %s544_s3 = inlined_call_operand.vmem [shape: f32[64,128], index: 3, kind: output, shape index: {}]  }
   0x1 LB: > { %s350_s13 = sadd.s32 4294967295, %s449_s12   ;;  %p354_p0 = scmp.ge.s32.totalorder %s449_s12, 1  ;;  %s449_s12 = sphi %s471_s12, %s13_s12  }
   0x2   : > { %p138_p1 = scmp.lt.s32.totalorder %s449_s12, 3 }
   0x4   : > { %p139_p2 = pnand %p354_p0, %p138_p1 }
   0x5   : > { %v178_v0 = vld [vmem:[%s542_s1] sm:$0xff] (!%p139_p2)  ;;  %v179_v1 = vld [vmem:[%s542_s1 + $0x8] sm:$0xff] (!%p139_p2)  ;;  %v180_v2 = vld [vmem:[%s542_s1 + $0x10] sm:$0xff] (!%p139_p2)  ;;  %s355_s20 = sshll.u32 (!%p139_p2), %s350_s13, 2  ;;  %vm192_vm0 = vcmask (!%p139_p2), 654336  }
   0x6   : > { %142 = sbr.rel (%p139_p2) target bundleno = 245 (0xf5), region = 32  ;;  %v405_v3 = vpack.c.bf16 (!%p139_p2), %v179_v1, %v178_v0  ;;  %v181_v4 = vld [vmem:[%s542_s1 + $0x18] sm:$0xff] (!%p139_p2)  ;;  %p163_p3 = scmp.lt.s32.totalorder (!%p139_p2), %s355_s20, 7  ;;  %v182_v6 = vld [vmem:[%s542_s1 + $0x20] sm:$0xff] (!%p139_p2)  ;;  %v183_v7 = vld [vmem:[%s542_s1 + $0x28] sm:$0xff] (!%p139_p2) }
   0x7   : > { %v409_v5 = vpack.c.bf16 (!%p139_p2), %v181_v4, %v180_v2  ;;  %v413_v8 = vpack.c.bf16 (!%p139_p2), %v183_v7, %v182_v6  ;;  %v184_v9 = vld [vmem:[%s542_s1 + $0x30] sm:$0xff] (!%p139_p2)  ;;  %v185_v10 = vld [vmem:[%s542_s1 + $0x38] sm:$0xff] (!%p139_p2)  ;;  %v186_v14 = vld [vmem:[%s542_s1 + $0x40] sm:$0xff] (!%p139_p2) }
   0x8   : > { %406 = vmatprep.subr.bf16.mxu0 (!%p139_p2), %v405_v3  ;;  %425 = vmatprep.subr.bf16.mxu1 (!%p139_p2), %v405_v3  ;;  %v417_v13 = vpack.c.bf16 (!%p139_p2), %v185_v10, %v184_v9  ;;  %v187_v15 = vld [vmem:[%s542_s1 + $0x48] sm:$0xff] (!%p139_p2)  ;;  %v188_v19 = vld [vmem:[%s543_s2] sm:$0xff] (!%p139_p2)  ;;  %v190_v20 = vld [vmem:[%s543_s2 + $0x10] sm:$0xff] (!%p139_p2) }
   0x9   : > { %408 = vmatpush3.bf16.msra.mxu0 (!%p139_p2), %v405_v3  ;;  %430 = vmatpush3.bf16.msra.mxu1 (!%p139_p2), %v405_v3  ;;  %v421_v16 = vpack.c.bf16 (!%p139_p2), %v187_v15, %v186_v14  ;;  %v189_v21 = vld [vmem:[%s543_s2 + $0x8] sm:$0xff] (!%p139_p2)  ;;  %v191_v27 = vld [vmem:[%s543_s2 + $0x18] sm:$0xff] (!%p139_p2) }
   0xa   : > { %410 = vmatprep.subr.bf16.mxu0 (!%p139_p2), %v409_v5  ;;  %426 = vmatprep.subr.bf16.mxu1 (!%p139_p2), %v409_v5 }
   0xd   : > { %s546_s20 = smov (!%p163_p3, %s355_s20), 7  ;;  %412 = vmatpush3.bf16.msra.mxu0 %v409_v5  ;;  %431 = vmatpush3.bf16.msra.mxu1 %v409_v5 }
   0xe   : > { %s356_s27 = sshll.u32 %s546_s20, 3  ;;  %414 = vmatprep.subr.bf16.mxu0 %v413_v8  ;;  %427 = vmatprep.subr.bf16.mxu1 %v413_v8 }
   0xf   : > { %s166_s7 = scalar_lea.vmem %s541_s0, %s356_s27  ;;  %s172_s22 = scalar_lea.vmem %s544_s3, %s356_s27 }
  0x10   : > { %v174_v11 = vld [vmem:[%s166_s7] sm:$0xff]  ;;  %v176_v12 = vld [vmem:[%s166_s7 + $0x10] sm:$0xff]  ;;  %v175_v17 = vld [vmem:[%s166_s7 + $0x8] sm:$0xff] }
  0x11   : > { %399 = vmatprep.mubr.msk.f32.mxu0 %vm192_vm0, %v174_v11  ;;  %402 = vmatprep.mubr.msk.f32.mxu1 %vm192_vm0, %v176_v12  ;;  %v177_v18 = vld [vmem:[%s166_s7 + $0x18] sm:$0xff] }
  0x12   : > { %416 = vmatpush3.bf16.msra.mxu0 %v413_v8  ;;  %432 = vmatpush3.bf16.msra.mxu1 %v413_v8 }
  0x13   : > { %418 = vmatprep.subr.bf16.mxu0 %v417_v13  ;;  %428 = vmatprep.subr.bf16.mxu1 %v417_v13 }
  0x16   : > { %420 = vmatpush3.bf16.msra.mxu0 %v417_v13  ;;  %433 = vmatpush3.bf16.msra.mxu1 %v417_v13 }
  0x17   : > { %422 = vmatprep.subr.bf16.mxu0 %v421_v16  ;;  %429 = vmatprep.subr.bf16.mxu1 %v421_v16 }
  0x1a   : > { %424 = vmatpush3.bf16.msra.mxu0 %v421_v16  ;;  %434 = vmatpush3.bf16.msra.mxu1 %v421_v16 }
  0x1d   : > { %400 = vmatmul.mubr.msk.f32.vlgmr.msra.gmra.mrb[0].mxu0 %vm192_vm0, %v175_v17  ;;  %403 = vmatmul.mubr.msk.f32.vlgmr.msra.gmra.mrb[0].mxu1 %vm192_vm0, %v177_v18 }
  0xf0   : > { %v401_v22 = vpop.f32.mrb[0].mxu0  ;;  %v404_v23 = vpop.f32.mrb[0].mxu1 }
  0xf1   : > { %v271_v24 = vpop.f32.mrb[1].mxu0  ;;  %v281_v25 = vpop.f32.mrb[1].mxu1  ;;  %v277_v29 = vadd.f32 %v401_v22, %v189_v21  ;;  %v287_v30 = vadd.f32 %v404_v23, %v191_v27 }
  0xf2   : > { %v272_v26 = vadd.f32 %v271_v24, %v188_v19  ;;  %v282_v28 = vadd.f32 %v281_v25, %v190_v20 }
  0xf3   : > { %291 = vst [vmem:[%s172_s22 + $0x8] sm:$0xff] %v277_v29  ;;  %293 = vst [vmem:[%s172_s22 + $0x18] sm:$0xff] %v287_v30 }
  0xf4   : > { %290 = vst [vmem:[%s172_s22] sm:$0xff] %v272_v26  ;;  %292 = vst [vmem:[%s172_s22 + $0x10] sm:$0xff] %v282_v28 }
  0xf5 PF: > { %s13_s12 = sadd.s32 1, %s449_s12  }
  0xf6   : > { %p10_p4 = scmp.ge.s32.totalorder %s13_s12, 4  }
  0xf8   :  { %12 = sbr.rel (!%p10_p4) target bundleno = 1 (0x1), region = 62 }

</bundles_post_ra>
